<compile_context>
chip_gen: v6e
topology: v6e:2x2x1
jax: 0.10.0
libtpu: 0.0.40
codegen_flags: <defaults>
</compile_context>

<pallas_src>
import functools

import jax
import jax.numpy as jnp
import numpy as np
from jax.experimental import pallas as pl
from jax.experimental.pallas import tpu as pltpu

# ---- model hyper-parameters (small, consistent with the module) ----
IN_FEATURES = 32     # D
LOW_RANK = 16        # R
NUM_EXPERTS = 4      # E
LAYER_NUM = 2        # L
BATCH = 16           # B

_LANE = 128          # TPU vreg lane width


def _make_kernel(mxu_dtype, approx_recip, stable_softmax):
    def crossnet_mix_kernel(x_ref, vg_ref, c_ref, u_ref, b_ref, exp_ref, o_ref):
        """One batch tile of CrossNetMix, transposed layout: batch on the lane axis.

        x_ref  : (D, TB)        f32        input tile (streams per grid step)
        vg_ref : (L, E*R+E, D)  mxu_dtype  [V_all | gating] per layer (VMEM-resident)
        c_ref  : (L, E*R, E*R)  mxu_dtype  block-diagonal C per layer
        u_ref  : (L, D, E*R)    mxu_dtype  concatenated U per layer
        b_ref  : (L, D, 1)      f32        bias per layer
        exp_ref: (E*R+1, E)     f32        0/1 expert->block expansion + all-ones denom row
        o_ref  : (D, TB)        f32        output tile
        """
        n_layers = u_ref.shape[0]
        er = c_ref.shape[1]                          # E * R

        x0 = x_ref[...].astype(jnp.float32)          # (D, TB); elementwise stays f32
        x_l = x0

        for l in range(n_layers):                    # static unroll (L = 2)
            # 1) One MXU push: all-expert V^T projection AND gating logits.
            proj = jnp.dot(vg_ref[l], x_l.astype(mxu_dtype),
                           preferred_element_type=jnp.float32)          # (E*R+E, TB)
            vx = jnp.tanh(proj[:er, :])                                  # (E*R, TB)
            gs = proj[er:, :]                                            # (E,   TB)

            # 2) Gating softmax over the expert (sublane) axis.
            if stable_softmax:
                gs = gs - jnp.max(gs, axis=0, keepdims=True)
            eg = jnp.exp(gs)                                             # (E, TB)
            # Fused expansion + denominator: rows [0, er) repeat eg per R-wide block,
            # row er is sum_e eg (softmax denominator) -- one tiny f32 MXU push.
            tmp = jnp.dot(exp_ref[...], eg,
                          preferred_element_type=jnp.float32)            # (E*R+1, TB)
            r = pl.reciprocal(tmp[er:er + 1, :], approx=approx_recip)    # (1, TB)
            w_rep = tmp[:er, :] * r                                      # (E*R, TB)
            sum_w = tmp[er:er + 1, :] * r                                # (1, TB)  ~= 1

            # 3) Per-expert C matmul as one block-diagonal matmul (no cross-expert mix).
            vx = jnp.tanh(jnp.dot(c_ref[l], vx.astype(mxu_dtype),
                                  preferred_element_type=jnp.float32))   # (E*R, TB)

            # 4) Fold softmax weights into vx, then ONE fused U matmul over all experts:
            #    uv = sum_e w_e * (U_e @ vx_e)
            uv = jnp.dot(u_ref[l], (vx * w_rep).astype(mxu_dtype),
                         preferred_element_type=jnp.float32)             # (D, TB)

            # 5) Bias hoisted out of the expert sum, scaled by sum_w so the result is
            #    exact even with the approximate EUP reciprocal above.
            x_l = x0 * (uv + b_ref[l] * sum_w) + x_l

        o_ref[...] = x_l.astype(o_ref.dtype)

    return crossnet_mix_kernel


@functools.partial(jax.jit,
                   static_argnames=("mxu_dtype", "approx_recip",
                                    "stable_softmax", "batch_tile"))
def crossnet_mix(x, U, V, C, bias, gating_w, *,
                 mxu_dtype=jnp.bfloat16, approx_recip=True,
                 stable_softmax=True, batch_tile=2048):
    """x: (B, D); U, V: (L, E, D, R); C: (L, E, R, R); bias: (L, D); gating_w: (E, D)."""
    B, D = x.shape
    L, E, _, R = U.shape
    er = E * R

    # ---- host-side parameter plumbing (once per compile; no in-kernel transposes) ----
    # Rows e*R+r of V_all_T[l] = V[l, e, :, r]; gating rows appended so the x_l
    # projection and the gating logits come out of a single matmul.
    V_all_T = jnp.transpose(V, (0, 1, 3, 2)).reshape(L, er, D)
    G_T = jnp.broadcast_to(gating_w[None, :, :], (L, E, D))
    VGt = jnp.concatenate([V_all_T, G_T], axis=1).astype(mxu_dtype)      # (L, E*R+E, D)

    # Block-diagonal C (transposed layout => diagonal blocks are C[l, e] directly).
    Cbd = jnp.einsum('ef,leij->leifj', jnp.eye(E, dtype=C.dtype), C
                     ).reshape(L, er, er).astype(mxu_dtype)              # (L, E*R, E*R)

    # Columns e*R+r of U_cat[l] = U[l, e, :, r].
    U_cat = jnp.transpose(U, (0, 2, 1, 3)).reshape(L, D, er).astype(mxu_dtype)  # (L, D, E*R)

    bias_t = bias.reshape(L, D, 1).astype(jnp.float32)                   # (L, D, 1)

    # 0/1 expansion (expert -> its R-wide row block) with an extra all-ones row that
    # produces the softmax denominator in the same MXU push.  Kept f32: exact 0/1 and
    # the exp() numerators should not be rounded to bf16.
    expand_plus = jnp.concatenate(
        [jnp.repeat(jnp.eye(E, dtype=jnp.float32), R, axis=0),
         jnp.ones((1, E), jnp.float32)], axis=0)                         # (E*R+1, E)

    # ---- lane-dense activation layout: batch along the 128-wide lane axis ----
    TB = max(_LANE, (min(int(batch_tile), max(B, _LANE)) // _LANE) * _LANE)
    B_pad = ((B + TB - 1) // TB) * TB
    num_tiles = B_pad // TB
    # TODO(synk): on v7x pick TB so num_tiles is even (2 TensorCores share the
    # "parallel" grid axis) and re-check per-tile VMEM against the 64 MiB budget.

    xT = jnp.zeros((D, B_pad), jnp.float32).at[:, :B].set(x.astype(jnp.float32).T)

    vmem = pltpu.MemorySpace.VMEM
    out_t = pl.pallas_call(
        _make_kernel(mxu_dtype, approx_recip, stable_softmax),
        grid=(num_tiles,),
        in_specs=[
            # Activations: one (D, TB) tile per grid step (double-buffered pipeline).
            pl.BlockSpec((D, TB), lambda i: (0, i)),
            # Parameters: whole-array, VMEM-resident across every batch tile.
            pl.BlockSpec(memory_space=vmem),      # VGt
            pl.BlockSpec(memory_space=vmem),      # Cbd
            pl.BlockSpec(memory_space=vmem),      # U_cat
            pl.BlockSpec(memory_space=vmem),      # bias
            pl.BlockSpec(memory_space=vmem),      # expand_plus
        ],
        out_specs=pl.BlockSpec((D, TB), lambda i: (0, i)),
        out_shape=jax.ShapeDtypeStruct((D, B_pad), jnp.float32),
        compiler_params=pltpu.CompilerParams(
            dimension_semantics=("parallel",)),
    )(xT, VGt, Cbd, U_cat, bias_t, expand_plus)

    return out_t[:, :B].T


def reference(x, U, V, C, bias, gating_w):
    """Pure-JAX reference mirroring the PyTorch forward exactly (no fusion)."""
    x0 = x[:, :, None]          # (B, D, 1)
    x_l = x0
    L, E = U.shape[0], U.shape[1]
    for l in range(L):
        outs, gates = [], []
        for e in range(E):
            gates.append(x_l[:, :, 0] @ gating_w[e])                 # (B,)
            vx = jnp.tanh(jnp.einsum('dr,bdo->bro', V[l, e], x_l))
            vx = jnp.tanh(jnp.einsum('rs,bso->bro', C[l, e], vx))
            uv = jnp.einsum('dr,bro->bdo', U[l, e], vx)
            dot_ = x0 * (uv + bias[l][None, :, None])
            outs.append(dot_[:, :, 0])
        outs = jnp.stack(outs, 2)                                    # (B, D, E)
        gsc = jax.nn.softmax(jnp.stack(gates, 1), axis=1)            # (B, E)
        moe = jnp.einsum('bde,be->bd', outs, gsc)[:, :, None]
        x_l = moe + x_l
    return x_l[:, :, 0]


def xavier_normal(key, shape):
    fan_in, fan_out = shape[-2], shape[-1]
    std = float(np.sqrt(2.0 / (fan_in + fan_out)))
    return std * jax.random.normal(key, shape, dtype=jnp.float32)


if __name__ == "__main__":
    key = jax.random.PRNGKey(0)
    keys = jax.random.split(key, 8)

    U = jnp.stack([xavier_normal(k, (NUM_EXPERTS, IN_FEATURES, LOW_RANK))
                   for k in jax.random.split(keys[0], LAYER_NUM)])        # (L,E,D,R)
    V = jnp.stack([xavier_normal(k, (NUM_EXPERTS, IN_FEATURES, LOW_RANK))
                   for k in jax.random.split(keys[1], LAYER_NUM)])        # (L,E,D,R)
    C = jnp.stack([xavier_normal(k, (NUM_EXPERTS, LOW_RANK, LOW_RANK))
                   for k in jax.random.split(keys[2], LAYER_NUM)])        # (L,E,R,R)
    # Non-zero bias so the sum_w-scaled bias hoisting is actually exercised.
    bias = 0.1 * jax.random.normal(keys[3], (LAYER_NUM, IN_FEATURES),
                                   dtype=jnp.float32)                     # (L,D)
    gating_w = 0.1 * jax.random.normal(keys[4], (NUM_EXPERTS, IN_FEATURES),
                                       dtype=jnp.float32)                 # (E,D)
    x = jax.random.normal(keys[5], (BATCH, IN_FEATURES), dtype=jnp.float32)

    ref = jax.block_until_ready(reference(x, U, V, C, bias, gating_w))

    # 1) Exact-math configuration (f32 MXU operands, exact reciprocal): tight structural
    #    check of the fused / transposed / batch-tiled kernel against the reference.
    out_exact = jax.block_until_ready(
        crossnet_mix(x, U, V, C, bias, gating_w,
                     mxu_dtype=jnp.float32, approx_recip=False))
    assert out_exact.shape == (BATCH, IN_FEATURES)
    np.testing.assert_allclose(np.asarray(out_exact), np.asarray(ref),
                               rtol=1e-5, atol=1e-5)

    # 2) Production configuration (v6e/v7x): bf16 MXU operands + EUP approximate
    #    reciprocal + unstabilized gating softmax (logits are O(0.1*|x|), bounded here).
    #    The tolerance is dominated by bf16 operand rounding compounded across the two
    #    cross layers and the |x0| scaling; check (1) above is the semantic gate.
    out_prod = jax.block_until_ready(
        crossnet_mix(x, U, V, C, bias, gating_w,
                     mxu_dtype=jnp.bfloat16, approx_recip=True,
                     stable_softmax=False))
    assert out_prod.shape == (BATCH, IN_FEATURES)
    np.testing.assert_allclose(np.asarray(out_prod), np.asarray(ref),
                               rtol=5e-2, atol=1e-1)

    print("KERNEL_OK")
</pallas_src>

<mosaic_0001>
module attributes {stable_mosaic.version = 11 : i64} {
  func.func @crossnet_mix_kernel(%arg0: i32, %arg1: memref<32x128xf32, #tpu.memory_space<vmem>>, %arg2: memref<2x68x32xf32, #tpu.memory_space<vmem>>, %arg3: memref<2x64x64xf32, #tpu.memory_space<vmem>>, %arg4: memref<2x32x64xf32, #tpu.memory_space<vmem>>, %arg5: memref<2x32x1xf32, #tpu.memory_space<vmem>>, %arg6: memref<65x4xf32, #tpu.memory_space<vmem>>, %arg7: memref<32x128xf32, #tpu.memory_space<vmem>>) attributes {dimension_semantics = [#tpu.dimension_semantics<parallel>], iteration_bounds = array<i64: 1>, scalar_prefetch = 0 : i64, scratch_operands = 0 : i64, tpu.core_type = #tpu.core_type<tc>, window_params = [{transform_indices = @transform_0, window_bounds = array<i64: 32, 128>}, {pipeline_mode = #tpu.pipeline_mode<synchronous>, transform_indices = @transform_1, window_bounds = array<i64: 2, 68, 32>}, {pipeline_mode = #tpu.pipeline_mode<synchronous>, transform_indices = @transform_2, window_bounds = array<i64: 2, 64, 64>}, {pipeline_mode = #tpu.pipeline_mode<synchronous>, transform_indices = @transform_3, window_bounds = array<i64: 2, 32, 64>}, {pipeline_mode = #tpu.pipeline_mode<synchronous>, transform_indices = @transform_4, window_bounds = array<i64: 2, 32, 1>}, {pipeline_mode = #tpu.pipeline_mode<synchronous>, transform_indices = @transform_5, window_bounds = array<i64: 65, 4>}, {transform_indices = @transform_6, window_bounds = array<i64: 32, 128>}]} {
    %c0 = arith.constant 0 : index
    %c0_0 = arith.constant 0 : index
    %0 = vector.load %arg1[%c0, %c0_0] : memref<32x128xf32, #tpu.memory_space<vmem>>, vector<32x128xf32>
    %c0_1 = arith.constant 0 : index
    %c0_2 = arith.constant 0 : index
    %c0_3 = arith.constant 0 : index
    %1 = vector.load %arg2[%c0_1, %c0_2, %c0_3] : memref<2x68x32xf32, #tpu.memory_space<vmem>>, vector<1x68x32xf32>
    %2 = vector.shape_cast %1 : vector<1x68x32xf32> to vector<68x32xf32>
    %cst = arith.constant dense<0.000000e+00> : vector<68x128xf32>
    %3 = tpu.matmul %2, %0, %cst {dimension_numbers = #tpu.dot_dimension_numbers<[1], [0], [0], [1], [0, 0, 1, 1], [], []>} : vector<68x32xf32>, vector<32x128xf32>, vector<68x128xf32> -> vector<68x128xf32>
    %4 = vector.extract_strided_slice %3 {offsets = [0, 0], sizes = [64, 128], strides = [1, 1]} : vector<68x128xf32> to vector<64x128xf32>
    %5 = math.tanh %4 : vector<64x128xf32>
    %6 = vector.extract_strided_slice %3 {offsets = [64, 0], sizes = [4, 128], strides = [1, 1]} : vector<68x128xf32> to vector<4x128xf32>
    %cst_4 = arith.constant dense<0xFF800000> : vector<128xf32>
    %7 = vector.multi_reduction <maximumf>, %6, %cst_4 [0] : vector<4x128xf32> to vector<128xf32>
    %8 = vector.shape_cast %7 : vector<128xf32> to vector<1x128xf32>
    %9 = vector.broadcast %8 : vector<1x128xf32> to vector<4x128xf32>
    %10 = arith.subf %6, %9 : vector<4x128xf32>
    %11 = math.exp %10 : vector<4x128xf32>
    %c0_5 = arith.constant 0 : index
    %c0_6 = arith.constant 0 : index
    %12 = vector.load %arg6[%c0_5, %c0_6] : memref<65x4xf32, #tpu.memory_space<vmem>>, vector<65x4xf32>
    %cst_7 = arith.constant dense<0.000000e+00> : vector<65x128xf32>
    %13 = tpu.matmul %12, %11, %cst_7 {dimension_numbers = #tpu.dot_dimension_numbers<[1], [0], [0], [1], [0, 0, 1, 1], [], []>} : vector<65x4xf32>, vector<4x128xf32>, vector<65x128xf32> -> vector<65x128xf32>
    %14 = vector.extract_strided_slice %13 {offsets = [64, 0], sizes = [1, 128], strides = [1, 1]} : vector<65x128xf32> to vector<1x128xf32>
    %15 = tpu.reciprocal %14 : vector<1x128xf32> -> vector<1x128xf32>
    %16 = vector.extract_strided_slice %13 {offsets = [0, 0], sizes = [64, 128], strides = [1, 1]} : vector<65x128xf32> to vector<64x128xf32>
    %17 = vector.broadcast %15 : vector<1x128xf32> to vector<64x128xf32>
    %18 = arith.mulf %16, %17 : vector<64x128xf32>
    %19 = vector.extract_strided_slice %13 {offsets = [64, 0], sizes = [1, 128], strides = [1, 1]} : vector<65x128xf32> to vector<1x128xf32>
    %20 = arith.mulf %19, %15 : vector<1x128xf32>
    %c0_8 = arith.constant 0 : index
    %c0_9 = arith.constant 0 : index
    %c0_10 = arith.constant 0 : index
    %21 = vector.load %arg3[%c0_8, %c0_9, %c0_10] : memref<2x64x64xf32, #tpu.memory_space<vmem>>, vector<1x64x64xf32>
    %22 = vector.shape_cast %21 : vector<1x64x64xf32> to vector<64x64xf32>
    %cst_11 = arith.constant dense<0.000000e+00> : vector<64x128xf32>
    %23 = tpu.matmul %22, %5, %cst_11 {dimension_numbers = #tpu.dot_dimension_numbers<[1], [0], [0], [1], [0, 0, 1, 1], [], []>} : vector<64x64xf32>, vector<64x128xf32>, vector<64x128xf32> -> vector<64x128xf32>
    %24 = math.tanh %23 : vector<64x128xf32>
    %c0_12 = arith.constant 0 : index
    %c0_13 = arith.constant 0 : index
    %c0_14 = arith.constant 0 : index
    %25 = vector.load %arg4[%c0_12, %c0_13, %c0_14] : memref<2x32x64xf32, #tpu.memory_space<vmem>>, vector<1x32x64xf32>
    %26 = vector.shape_cast %25 : vector<1x32x64xf32> to vector<32x64xf32>
    %27 = arith.mulf %24, %18 : vector<64x128xf32>
    %cst_15 = arith.constant dense<0.000000e+00> : vector<32x128xf32>
    %28 = tpu.matmul %26, %27, %cst_15 {dimension_numbers = #tpu.dot_dimension_numbers<[1], [0], [0], [1], [0, 0, 1, 1], [], []>} : vector<32x64xf32>, vector<64x128xf32>, vector<32x128xf32> -> vector<32x128xf32>
    %c0_16 = arith.constant 0 : index
    %c0_17 = arith.constant 0 : index
    %c0_18 = arith.constant 0 : index
    %29 = vector.load %arg5[%c0_16, %c0_17, %c0_18] : memref<2x32x1xf32, #tpu.memory_space<vmem>>, vector<1x32x1xf32>
    %30 = vector.shape_cast %29 : vector<1x32x1xf32> to vector<32x1xf32>
    %31 = vector.broadcast %30 : vector<32x1xf32> to vector<32x128xf32>
    %32 = vector.broadcast %20 : vector<1x128xf32> to vector<32x128xf32>
    %33 = arith.mulf %31, %32 : vector<32x128xf32>
    %34 = arith.addf %28, %33 : vector<32x128xf32>
    %35 = arith.mulf %0, %34 : vector<32x128xf32>
    %36 = arith.addf %35, %0 : vector<32x128xf32>
    %c1 = arith.constant 1 : index
    %c0_19 = arith.constant 0 : index
    %c0_20 = arith.constant 0 : index
    %37 = vector.load %arg2[%c1, %c0_19, %c0_20] : memref<2x68x32xf32, #tpu.memory_space<vmem>>, vector<1x68x32xf32>
    %38 = vector.shape_cast %37 : vector<1x68x32xf32> to vector<68x32xf32>
    %cst_21 = arith.constant dense<0.000000e+00> : vector<68x128xf32>
    %39 = tpu.matmul %38, %36, %cst_21 {dimension_numbers = #tpu.dot_dimension_numbers<[1], [0], [0], [1], [0, 0, 1, 1], [], []>} : vector<68x32xf32>, vector<32x128xf32>, vector<68x128xf32> -> vector<68x128xf32>
    %40 = vector.extract_strided_slice %39 {offsets = [0, 0], sizes = [64, 128], strides = [1, 1]} : vector<68x128xf32> to vector<64x128xf32>
    %41 = math.tanh %40 : vector<64x128xf32>
    %42 = vector.extract_strided_slice %39 {offsets = [64, 0], sizes = [4, 128], strides = [1, 1]} : vector<68x128xf32> to vector<4x128xf32>
    %cst_22 = arith.constant dense<0xFF800000> : vector<128xf32>
    %43 = vector.multi_reduction <maximumf>, %42, %cst_22 [0] : vector<4x128xf32> to vector<128xf32>
    %44 = vector.shape_cast %43 : vector<128xf32> to vector<1x128xf32>
    %45 = vector.broadcast %44 : vector<1x128xf32> to vector<4x128xf32>
    %46 = arith.subf %42, %45 : vector<4x128xf32>
    %47 = math.exp %46 : vector<4x128xf32>
    %c0_23 = arith.constant 0 : index
    %c0_24 = arith.constant 0 : index
    %48 = vector.load %arg6[%c0_23, %c0_24] : memref<65x4xf32, #tpu.memory_space<vmem>>, vector<65x4xf32>
    %cst_25 = arith.constant dense<0.000000e+00> : vector<65x128xf32>
    %49 = tpu.matmul %48, %47, %cst_25 {dimension_numbers = #tpu.dot_dimension_numbers<[1], [0], [0], [1], [0, 0, 1, 1], [], []>} : vector<65x4xf32>, vector<4x128xf32>, vector<65x128xf32> -> vector<65x128xf32>
    %50 = vector.extract_strided_slice %49 {offsets = [64, 0], sizes = [1, 128], strides = [1, 1]} : vector<65x128xf32> to vector<1x128xf32>
    %51 = tpu.reciprocal %50 : vector<1x128xf32> -> vector<1x128xf32>
    %52 = vector.extract_strided_slice %49 {offsets = [0, 0], sizes = [64, 128], strides = [1, 1]} : vector<65x128xf32> to vector<64x128xf32>
    %53 = vector.broadcast %51 : vector<1x128xf32> to vector<64x128xf32>
    %54 = arith.mulf %52, %53 : vector<64x128xf32>
    %55 = vector.extract_strided_slice %49 {offsets = [64, 0], sizes = [1, 128], strides = [1, 1]} : vector<65x128xf32> to vector<1x128xf32>
    %56 = arith.mulf %55, %51 : vector<1x128xf32>
    %c1_26 = arith.constant 1 : index
    %c0_27 = arith.constant 0 : index
    %c0_28 = arith.constant 0 : index
    %57 = vector.load %arg3[%c1_26, %c0_27, %c0_28] : memref<2x64x64xf32, #tpu.memory_space<vmem>>, vector<1x64x64xf32>
    %58 = vector.shape_cast %57 : vector<1x64x64xf32> to vector<64x64xf32>
    %cst_29 = arith.constant dense<0.000000e+00> : vector<64x128xf32>
    %59 = tpu.matmul %58, %41, %cst_29 {dimension_numbers = #tpu.dot_dimension_numbers<[1], [0], [0], [1], [0, 0, 1, 1], [], []>} : vector<64x64xf32>, vector<64x128xf32>, vector<64x128xf32> -> vector<64x128xf32>
    %60 = math.tanh %59 : vector<64x128xf32>
    %c1_30 = arith.constant 1 : index
    %c0_31 = arith.constant 0 : index
    %c0_32 = arith.constant 0 : index
    %61 = vector.load %arg4[%c1_30, %c0_31, %c0_32] : memref<2x32x64xf32, #tpu.memory_space<vmem>>, vector<1x32x64xf32>
    %62 = vector.shape_cast %61 : vector<1x32x64xf32> to vector<32x64xf32>
    %63 = arith.mulf %60, %54 : vector<64x128xf32>
    %cst_33 = arith.constant dense<0.000000e+00> : vector<32x128xf32>
    %64 = tpu.matmul %62, %63, %cst_33 {dimension_numbers = #tpu.dot_dimension_numbers<[1], [0], [0], [1], [0, 0, 1, 1], [], []>} : vector<32x64xf32>, vector<64x128xf32>, vector<32x128xf32> -> vector<32x128xf32>
    %c1_34 = arith.constant 1 : index
    %c0_35 = arith.constant 0 : index
    %c0_36 = arith.constant 0 : index
    %65 = vector.load %arg5[%c1_34, %c0_35, %c0_36] : memref<2x32x1xf32, #tpu.memory_space<vmem>>, vector<1x32x1xf32>
    %66 = vector.shape_cast %65 : vector<1x32x1xf32> to vector<32x1xf32>
    %67 = vector.broadcast %66 : vector<32x1xf32> to vector<32x128xf32>
    %68 = vector.broadcast %56 : vector<1x128xf32> to vector<32x128xf32>
    %69 = arith.mulf %67, %68 : vector<32x128xf32>
    %70 = arith.addf %64, %69 : vector<32x128xf32>
    %71 = arith.mulf %0, %70 : vector<32x128xf32>
    %72 = arith.addf %71, %36 : vector<32x128xf32>
    %c0_37 = arith.constant 0 : index
    %c0_38 = arith.constant 0 : index
    %73 = vector.load %arg7[%c0_37, %c0_38] : memref<32x128xf32, #tpu.memory_space<vmem>>, vector<32x128xf32>
    tpu.vector_store %arg7[%c0_37, %c0_38], %72 {strides = array<i32>} : memref<32x128xf32, #tpu.memory_space<vmem>>, vector<32x128xf32>,
    return
  }
  func.func @transform_0(%arg0: i32) -> (i32, i32) {
    %c0_i32 = arith.constant 0 : i32
    %c0_i32_0 = arith.constant 0 : i32
    return %c0_i32, %arg0 : i32, i32
  }
  func.func @transform_1(%arg0: i32) -> (i32, i32, i32) {
    %c0_i32 = arith.constant 0 : i32
    %c0_i32_0 = arith.constant 0 : i32
    %c0_i32_1 = arith.constant 0 : i32
    %c0_i32_2 = arith.constant 0 : i32
    return %c0_i32, %c0_i32_0, %c0_i32_1 : i32, i32, i32
  }
  func.func @transform_2(%arg0: i32) -> (i32, i32, i32) {
    %c0_i32 = arith.constant 0 : i32
    %c0_i32_0 = arith.constant 0 : i32
    %c0_i32_1 = arith.constant 0 : i32
    %c0_i32_2 = arith.constant 0 : i32
    return %c0_i32, %c0_i32_0, %c0_i32_1 : i32, i32, i32
  }
  func.func @transform_3(%arg0: i32) -> (i32, i32, i32) {
    %c0_i32 = arith.constant 0 : i32
    %c0_i32_0 = arith.constant 0 : i32
    %c0_i32_1 = arith.constant 0 : i32
    %c0_i32_2 = arith.constant 0 : i32
    return %c0_i32, %c0_i32_0, %c0_i32_1 : i32, i32, i32
  }
  func.func @transform_4(%arg0: i32) -> (i32, i32, i32) {
    %c0_i32 = arith.constant 0 : i32
    %c0_i32_0 = arith.constant 0 : i32
    %c0_i32_1 = arith.constant 0 : i32
    %c0_i32_2 = arith.constant 0 : i32
    return %c0_i32, %c0_i32_0, %c0_i32_1 : i32, i32, i32
  }
  func.func @transform_5(%arg0: i32) -> (i32, i32) {
    %c0_i32 = arith.constant 0 : i32
    %c0_i32_0 = arith.constant 0 : i32
    %c0_i32_1 = arith.constant 0 : i32
    return %c0_i32, %c0_i32_0 : i32, i32
  }
  func.func @transform_6(%arg0: i32) -> (i32, i32) {
    %c0_i32 = arith.constant 0 : i32
    %c0_i32_0 = arith.constant 0 : i32
    return %c0_i32, %arg0 : i32, i32
  }
}

</mosaic_0001>

<bundles_post_ra>
// kernel: crossnet_mix.1
= control target key start
LH: loop header
LB: loop body
LE: loop exit
PB: predicated region body
PF: predicated region fallthrough
CT: control target
= control target key end

     0   :  { %v1745_v0 = vmov 0.0   ;;  %vm1746_vm0 = vmmov 0   ;;  %vm36_vm1 = vcmask 261120   ;;  %v1747_v14 = vmov 0   ;;  %s2228_s0 = inlined_call_operand.vmem [shape: f32[32,128], index: 0, kind: input, shape index: {}]   ;;  %s2229_s1 = inlined_call_operand.vmem [shape: f32[2,68,32], index: 1, kind: input, shape index: {}]   ;;  %s2230_s4 = inlined_call_operand.vmem [shape: f32[2,32,1], index: 4, kind: input, shape index: {}]   ;;  %s2231_s5 = inlined_call_operand.vmem [shape: f32[65,4], index: 5, kind: input, shape index: {}]   ;;  %s2232_s2 = inlined_call_operand.vmem [shape: f32[2,64,64], index: 2, kind: input, shape index: {}]   ;;  %s2233_s3 = inlined_call_operand.vmem [shape: f32[2,32,64], index: 3, kind: input, shape index: {}]   ;;  %s2234_s6 = inlined_call_operand.vmem [shape: f32[32,128], index: 6, kind: output, shape index: {}]  }
   0x1   :  { %1438 = vmatprep.subr.mxu0 %v1745_v0  ;;  %v1787_v1 = vld [vmem:[%s2228_s0 + $0x18] sm:$0xff]  ;;  %v1792_v2 = vld [vmem:[%s2228_s0 + $0x10] sm:$0xff]  ;;  %1446 = vmatprep.mubr.msk.f32.mxu0 %vm1746_vm0, %v1745_v0  ;;  %v1802_v3 = vld [vmem:[%s2228_s0 + $0x8] sm:$0xff]  ;;  %vm182_vm2 = vcmask 1043456   ;;  %vm202_vm3 = vcmask 31744   ;;  %vm365_vm4 = vcmask 523264  }
   0x2   :  { %1439 = vmatpush3.msra.mxu0 %v1787_v1  ;;  %1473 = vmatprep.subr.mxu1 %v1745_v0  ;;  %v1811_v4 = vld [vmem:[%s2228_s0] sm:$0xff]  ;;  %v28_v6 = vld [vmem:[%s2229_s1 + $0x8] sm:$0xff]  ;;  %v29_v7 = vld [vmem:[%s2229_s1 + $0x10] sm:$0xff] }
   0x3   :  { %1440 = vmatprep.subr.mxu0 %v1745_v0  ;;  %1475 = vmatprep.mubr.msk.f32.mxu1 %vm1746_vm0, %v1745_v0  ;;  %v27_v5 = vld [vmem:[%s2229_s1] sm:$0xff]  ;;  %v30_v8 = vld [vmem:[%s2229_s1 + $0x18] sm:$0xff]  ;;  %v32_v10 = vld [vmem:[%s2229_s1 + $0x28] sm:$0xff] }
   0x4   :  { %1441 = vmatpush3.msra.mxu0 %v1792_v2  ;;  %v31_v9 = vld [vmem:[%s2229_s1 + $0x20] sm:$0xff]  ;;  %v33_v11 = vld [vmem:[%s2229_s1 + $0x30] sm:$0xff]  ;;  %v34_v12 = vld [vmem:[%s2229_s1 + $0x38] sm:$0xff]  ;;  %1670 = vset.pattern.permute.xlu1 %v1747_v14 }
   0x5   :  { %1442 = vmatprep.subr.mxu0 %v1745_v0  ;;  %v35_v13 = vld [vmem:[%s2229_s1 + $0x40] sm:$0xf]  ;;  %1669 = vset.pattern.permute.xlu0 %v1747_v14  ;;  %v518_v15 = vld [vmem:[%s2230_s4 + $0x18] sm:$0xff]  ;;  %v516_v16 = vld [vmem:[%s2230_s4 + $0x8] sm:$0xff] }
   0x6   :  { %1443 = vmatpush3.msra.mxu0 %v1802_v3  ;;  %536 = vperm.xlu0 %1669, %v518_v15   ;;  %v517_v17 = vld [vmem:[%s2230_s4 + $0x10] sm:$0xff]  ;;  %v515_v18 = vld [vmem:[%s2230_s4] sm:$0xff]  ;;  %v1894_v50 = vld [vmem:[%s2231_s5 + $0x8] sm:$0xff] }
   0x7   :  { %1444 = vmatprep.subr.mxu0 %v1745_v0  ;;  %526 = vperm.xlu1 %1670, %v516_v16   ;;  %v1884_v46 = vld [vmem:[%s2231_s5] sm:$0xff]  ;;  %v1903_v53 = vld [vmem:[%s2231_s5 + $0x10] sm:$0xff]  ;;  %v1912_v56 = vld [vmem:[%s2231_s5 + $0x18] sm:$0xff] }
   0x8   :  { %1445 = vmatpush3.msra.mxu0 %v1811_v4  ;;  %v1921_v59 = vld [vmem:[%s2231_s5 + $0x20] sm:$0xff]  ;;  %v1931_v60 = vld [vmem:[%s2231_s5 + $0x28] sm:$0xff]  ;;  %v1940_v61 = vld [vmem:[%s2231_s5 + $0x30] sm:$0xff] }
   0x9   :  { %1447 = vmatmul.mubr.msk.f32.vlgmr.msra.gmra.mxu0 %vm36_vm1, %v27_v5  ;;  %v1949_v62 = vld [vmem:[%s2231_s5 + $0x38] sm:$0xff]  ;;  %v1958_v63 = vld [vmem:[%s2231_s5 + $0x40] sm:$0x1]  ;;  %v1329_v15 = vld [vmem:[%s2230_s4 + $0x28] sm:$0xff] }
   0xa   :  { %1449 = vmatprep.mubr.msk.f32.mxu0 %vm1746_vm0, %v1745_v0  ;;  %531 = vperm.xlu0 %1669, %v517_v17   ;;  %v357_v5 = vld [vmem:[%s2232_s2] sm:$0xff]  ;;  %v1330_v16 = vld [vmem:[%s2230_s4 + $0x30] sm:$0xff]  ;;  %v1331_v17 = vld [vmem:[%s2230_s4 + $0x38] sm:$0xff] }
   0xb   :  { %521 = vperm.xlu1 %1670, %v515_v18   ;;  %v1328_v14 = vld [vmem:[%s2230_s4 + $0x20] sm:$0xff] }
   0xd   :  { %1450 = vmatmul.mubr.msk.f32.gmra.mxu0 %vm36_vm1, %v28_v6  ;;  %v358_v6 = vld [vmem:[%s2232_s2 + $0x8] sm:$0xff] }
   0xe   :  { %1452 = vmatprep.mubr.msk.f32.mxu0 %vm1746_vm0, %v1745_v0  ;;  %1110 = vperm.xlu0 %1669, %v1328_v14  }
   0xf   :  { %1115 = vperm.xlu1 %1670, %v1329_v15  }
  0x11   :  { %1453 = vmatmul.mubr.msk.f32.gmra.mxu0 %vm36_vm1, %v29_v7  ;;  %v359_v7 = vld [vmem:[%s2232_s2 + $0x10] sm:$0xff] }
  0x12   :  { %1455 = vmatprep.mubr.msk.f32.mxu0 %vm1746_vm0, %v1745_v0  ;;  %1120 = vperm.xlu0 %1669, %v1330_v16  }
  0x13   :  { %1125 = vperm.xlu1 %1670, %v1331_v17  }
  0x15   :  { %1456 = vmatmul.mubr.msk.f32.gmra.mxu0 %vm36_vm1, %v30_v8  ;;  %v360_v8 = vld [vmem:[%s2232_s2 + $0x18] sm:$0xff] }
  0x16   :  { %1458 = vmatprep.mubr.msk.f32.mxu0 %vm1746_vm0, %v1745_v0 }
  0x19   :  { %1459 = vmatmul.mubr.msk.f32.gmra.mxu0 %vm36_vm1, %v31_v9  ;;  %v361_v9 = vld [vmem:[%s2232_s2 + $0x20] sm:$0xff] }
  0x1a   :  { %1461 = vmatprep.mubr.msk.f32.mxu0 %vm1746_vm0, %v1745_v0 }
  0x1d   :  { %1462 = vmatmul.mubr.msk.f32.gmra.mxu0 %vm36_vm1, %v32_v10  ;;  %v362_v10 = vld [vmem:[%s2232_s2 + $0x28] sm:$0xff] }
  0x1e   :  { %1464 = vmatprep.mubr.msk.f32.mxu0 %vm1746_vm0, %v1745_v0 }
  0x21   :  { %1465 = vmatmul.mubr.msk.f32.gmra.mxu0 %vm36_vm1, %v33_v11  ;;  %v363_v11 = vld [vmem:[%s2232_s2 + $0x30] sm:$0xff] }
  0x22   :  { %1467 = vmatprep.mubr.msk.f32.mxu0 %vm1746_vm0, %v1745_v0 }
  0x25   :  { %1468 = vmatmul.mubr.msk.f32.gmra.mxu0 %vm36_vm1, %v34_v12  ;;  %v364_v12 = vld [vmem:[%s2232_s2 + $0x38] sm:$0xff] }
  0x26   :  { %1470 = vmatprep.mubr.msk.f32.mxu0 %vm1746_vm0, %v1745_v0 }
  0x29   :  { %1471 = vmatmul.mubr.msk.f32.gmra.mxu0 %vm36_vm1, %v35_v13  ;;  %v503_v13 = vld [vmem:[%s2233_s3] sm:$0xff] }
  0x2a   :  { %1546 = vmatprep.mubr.msk.f32.mxu0 %vm365_vm4, %v503_v13 }
  0xc9   :  { %v130_v19 = vpop.f32.mrf.mxu0 }
  0xcb   :  { %v1448_v20 = vpop.f32.mrf.mxu0 }
  0xcd   :  { %v135_v21 = vpop.f32.mrf.mxu0 }
  0xcf   :  { %v1451_v22 = vpop.f32.mrf.mxu0 }
  0xd1   :  { %v140_v23 = vpop.f32.mrf.mxu0 }
  0xd3   :  { %v1454_v24 = vpop.f32.mrf.mxu0 }
  0xd5   :  { %v145_v25 = vpop.f32.mrf.mxu0 }
  0xd7   :  { %v1457_v26 = vpop.f32.mrf.mxu0 }
  0xd9   :  { %v150_v27 = vpop.f32.mrf.mxu0 }
  0xdb   :  { %v1460_v28 = vpop.f32.mrf.mxu0 }
  0xdd   :  { %v155_v29 = vpop.f32.mrf.mxu0 }
  0xdf   :  { %v1463_v30 = vpop.f32.mrf.mxu0 }
  0xe1   :  { %v160_v31 = vpop.f32.mrf.mxu0 }
  0xe3   :  { %v1466_v32 = vpop.f32.mrf.mxu0 }
  0xe5   :  { %v165_v33 = vpop.f32.mrf.mxu0 }
  0xe7   :  { %v1469_v34 = vpop.f32.mrf.mxu0 }
  0xe9   :  { %v170_v35 = vpop.f32.mrf.mxu0 }
  0xea   :  { %v183_v36 = vsel %vm182_vm2, %v170_v35, -inf }
  0xeb   :  { %v184_v37 = vrot.slane %v183_v36, 4  ;;  %v1472_v38 = vpop.f32.mrf.mxu0 }
  0xed   :  { %v185_v39 = vmax.f32 %v183_v36, %v184_v37 }
  0xef   :  { %v186_v40 = vrot.slane %v185_v39, 2 }
  0xf1   :  { %v187_v41 = vmax.f32 %v185_v39, %v186_v40 }
  0xf3   :  { %v188_v42 = vrot.slane %v187_v41, 1 }
  0xf5   :  { %v189_v43 = vmax.f32 %v187_v41, %v188_v42  ;;  %v344_v41 = vlaneseq }
  0xf7   :  { %v190_v44 = vsub.f32 %v170_v35, %v189_v43 }
  0xf9   :  { %v191_v45 = vmul.f32 1.442695, %v190_v44 }
  0xfb   :  { %1671 = vpow2.f32 %v191_v45 }
  0xfc   :  { %1673 = vtanh.f32 %v165_v33 }
  0xfd   :  { %1675 = vtanh.f32 %v160_v31 }
  0xfe   :  { %1677 = vtanh.f32 %v155_v29 }
  0xff   :  { %1679 = vtanh.f32 %v150_v27 }
 0x100   :  { %1681 = vtanh.f32 %v145_v25 }
 0x101   :  { %1683 = vtanh.f32 %v140_v23 }
 0x102   :  { %1685 = vtanh.f32 %v135_v21 }
 0x103   :  { %1687 = vtanh.f32 %v130_v19 }
 0x108   :  { %v1672_v47 = vpop.eup %1671 }
 0x109   :  { %v1674_v48 = vpop.eup %1673  ;;  %1474 = vmatpush3.msk.msra.mxu1 %vm182_vm2, %v1672_v47  ;;  %v345_v47 = vshrl.u32 %v344_v41, 7 }
 0x10a   :  { %1476 = vmatmul.mubr.msk.f32.vlgmr.msra.gmra.mxu1 %vm202_vm3, %v1884_v46  ;;  %1502 = vmatprep.subr.mxu1 %v1674_v48  ;;  %v1676_v49 = vpop.eup %1675 }
 0x10b   :  { %1503 = vmatpush3.msra.mxu1 %v1674_v48  ;;  %1478 = vmatprep.mubr.msk.f32.mxu1 %vm1746_vm0, %v1745_v0  ;;  %v1678_v51 = vpop.eup %1677 }
 0x10c   :  { %1504 = vmatprep.subr.mxu1 %v1676_v49  ;;  %v1680_v52 = vpop.eup %1679 }
 0x10d   :  { %1505 = vmatpush3.msra.mxu1 %v1676_v49  ;;  %v1682_v54 = vpop.eup %1681  ;;  %v2018_v49 = vsub.s32 0, %v345_v47 }
 0x10e   :  { %1479 = vmatmul.mubr.msk.f32.gmra.mxu1 %vm202_vm3, %v1894_v50  ;;  %1506 = vmatprep.subr.mxu1 %v1678_v51  ;;  %v1684_v55 = vpop.eup %1683 }
 0x10f   :  { %1507 = vmatpush3.msra.mxu1 %v1678_v51  ;;  %1481 = vmatprep.mubr.msk.f32.mxu1 %vm1746_vm0, %v1745_v0  ;;  %v1686_v57 = vpop.eup %1685 }
 0x110   :  { %1508 = vmatprep.subr.mxu1 %v1680_v52  ;;  %v1688_v58 = vpop.eup %1687 }
 0x111   :  { %1509 = vmatpush3.msra.mxu1 %v1680_v52 }
 0x112   :  { %1482 = vmatmul.mubr.msk.f32.gmra.mxu1 %vm202_vm3, %v1903_v53  ;;  %1510 = vmatprep.subr.mxu1 %v1682_v54 }
 0x113   :  { %1511 = vmatpush3.msra.mxu1 %v1682_v54  ;;  %1484 = vmatprep.mubr.msk.f32.mxu1 %vm1746_vm0, %v1745_v0 }
 0x114   :  { %1512 = vmatprep.subr.mxu1 %v1684_v55 }
 0x115   :  { %1513 = vmatpush3.msra.mxu1 %v1684_v55 }
 0x116   :  { %1485 = vmatmul.mubr.msk.f32.gmra.mxu1 %vm202_vm3, %v1912_v56  ;;  %1514 = vmatprep.subr.mxu1 %v1686_v57 }
 0x117   :  { %1515 = vmatpush3.msra.mxu1 %v1686_v57  ;;  %1487 = vmatprep.mubr.msk.f32.mxu1 %vm1746_vm0, %v1745_v0 }
 0x118   :  { %1516 = vmatprep.subr.mxu1 %v1688_v58 }
 0x119   :  { %1517 = vmatpush3.msra.mxu1 %v1688_v58 }
 0x11a   :  { %1488 = vmatmul.mubr.msk.f32.gmra.mxu1 %vm202_vm3, %v1921_v59  ;;  %1587 = vmatprep.subr.mxu1 %v1745_v0 }
 0x11b   :  { %1490 = vmatprep.mubr.msk.f32.mxu1 %vm1746_vm0, %v1745_v0 }
 0x11e   :  { %1491 = vmatmul.mubr.msk.f32.gmra.mxu1 %vm202_vm3, %v1931_v60 }
 0x11f   :  { %1493 = vmatprep.mubr.msk.f32.mxu1 %vm1746_vm0, %v1745_v0 }
 0x122   :  { %1494 = vmatmul.mubr.msk.f32.gmra.mxu1 %vm202_vm3, %v1940_v61 }
 0x123   :  { %1496 = vmatprep.mubr.msk.f32.mxu1 %vm1746_vm0, %v1745_v0 }
 0x126   :  { %1497 = vmatmul.mubr.msk.f32.gmra.mxu1 %vm202_vm3, %v1949_v62 }
 0x127   :  { %1499 = vmatprep.mubr.msk.f32.mxu1 %vm1746_vm0, %v1745_v0 }
 0x12a   :  { %1500 = vmatmul.mubr.msk.f32.gmra.mxu1 %vm202_vm3, %v1958_v63 }
 0x12b   :  { %1518 = vmatprep.mubr.msk.f32.mxu1 %vm365_vm4, %v357_v5 }
 0x12e   :  { %1519 = vmatmul.mubr.msk.f32.vlgmr.msra.gmra.mxu1 %vm365_vm4, %v358_v6 }
 0x12f   :  { %1521 = vmatprep.mubr.msk.f32.mxu1 %vm365_vm4, %v359_v7 }
 0x132   :  { %1522 = vmatmul.mubr.msk.f32.gmra.mxu1 %vm365_vm4, %v360_v8 }
 0x133   :  { %1524 = vmatprep.mubr.msk.f32.mxu1 %vm365_vm4, %v361_v9 }
 0x136   :  { %1525 = vmatmul.mubr.msk.f32.gmra.mxu1 %vm365_vm4, %v362_v10 }
 0x137   :  { %1527 = vmatprep.mubr.msk.f32.mxu1 %vm365_vm4, %v363_v11 }
 0x13a   :  { %1528 = vmatmul.mubr.msk.f32.gmra.mxu1 %vm365_vm4, %v364_v12 }
 0x13b   :  { %1589 = vmatprep.mubr.msk.f32.mxu1 %vm1746_vm0, %v1745_v0 }
 0x1ca   :  { %v2012_v18 = vpop.f32.mrf.mxu1 }
 0x1cc   :  { %v1477_v19 = vpop.f32.mrf.mxu1 }
 0x1ce   :  { %v2014_v20 = vpop.f32.mrf.mxu1 }
 0x1d0   :  { %v1480_v21 = vpop.f32.mrf.mxu1 }
 0x1d2   :  { %v309_v22 = vpop.f32.mrf.mxu1 }
 0x1d4   :  { %v1483_v23 = vpop.f32.mrf.mxu1 }
 0x1d6   :  { %v314_v24 = vpop.f32.mrf.mxu1 }
 0x1d8   :  { %v1486_v25 = vpop.f32.mrf.mxu1 }
 0x1da   :  { %v319_v26 = vpop.f32.mrf.mxu1 }
 0x1dc   :  { %v1489_v27 = vpop.f32.mrf.mxu1 }
 0x1dd   :  { %v537_v27 = vpop.permute.xlu0 %536 }
 0x1de   :  { %v324_v28 = vpop.f32.mrf.mxu1 }
 0x1e0   :  { %v1492_v29 = vpop.f32.mrf.mxu1 }
 0x1e2   :  { %v329_v30 = vpop.f32.mrf.mxu1 }
 0x1e4   :  { %v1495_v31 = vpop.f32.mrf.mxu1 }
 0x1e5   :  { %v532_v31 = vpop.permute.xlu0 %531 }
 0x1e6   :  { %v334_v32 = vpop.f32.mrf.mxu1 }
 0x1e8   :  { %v1498_v33 = vpop.f32.mrf.mxu1 }
 0x1ea   :  { %v339_v34 = vpop.f32.mrf.mxu1 }
 0x1eb   :  { %1689 = vrcp.f32 %v339_v34 }
 0x1ec   :  { %v1501_v35 = vpop.f32.mrf.mxu1 }
 0x1ee   :  { %v1520_v36 = vpop.f32.mrf.mxu1 }
 0x1f0   :  { %v456_v37 = vpop.f32.mrf.mxu1 }
 0x1f2   :  { %v1523_v38 = vpop.f32.mrf.mxu1 }
 0x1f4   :  { %v466_v39 = vpop.f32.mrf.mxu1 }
 0x1f6   :  { %v1526_v40 = vpop.f32.mrf.mxu1 }
 0x1f8   :  { %v1690_v42 = vpop.eup %1689  ;;  %v476_v43 = vpop.f32.mrf.mxu1 }
 0x1f9   :  { %v2016_v44 = vmul.f32 %v1690_v42, %v339_v34  ;;  %v347_v51 = vrot.slane %v1690_v42, %v2018_v49 }
 0x1fa   :  { %v1529_v45 = vpop.f32.mrf.mxu1 }
 0x1fb   :  { %1691 = vtanh.f32 %v1529_v45  ;;  %v355_v52 = vmul.f32 %v347_v51, %v334_v32  ;;  %v354_v58 = vmul.f32 %v347_v51, %v329_v30  ;;  %v353_v7 = vmul.f32 %v347_v51, %v324_v28  ;;  %v527_v28 = vpop.permute.xlu1 %526 }
 0x1fc   :  { %v486_v48 = vpop.f32.mrf.mxu1  ;;  %1693 = vtanh.f32 %v1526_v40  ;;  %v352_v10 = vmul.f32 %v347_v51, %v319_v26  ;;  %v351_v13 = vmul.f32 %v347_v51, %v314_v24  ;;  %v350_v16 = vmul.f32 %v347_v51, %v309_v22  ;;  %v504_v22 = vld [vmem:[%s2233_s3 + $0x8] sm:$0xff] }
 0x1fd   :  { %1695 = vtanh.f32 %v486_v48  ;;  %v349_v17 = vmul.f32 %v347_v51, %v2014_v20  ;;  %v348_v26 = vmul.f32 %v347_v51, %v2012_v18  ;;  %v505_v20 = vld [vmem:[%s2233_s3 + $0x10] sm:$0xff]  ;;  %v506_v18 = vld [vmem:[%s2233_s3 + $0x18] sm:$0xff]  ;;  %v542_v29 = vrot.slane %v2016_v44, %v2018_v49 }
 0x1fe   :  { %1697 = vtanh.f32 %v476_v43 }
 0x1ff   :  { %1699 = vtanh.f32 %v1523_v38  ;;  %v522_v32 = vpop.permute.xlu1 %521  ;;  %v546_v34 = vmul.f32 %v542_v29, %v537_v27  ;;  %v544_v35 = vmul.f32 %v542_v29, %v527_v28 }
 0x200   :  { %1701 = vtanh.f32 %v466_v39  ;;  %v543_v38 = vmul.f32 %v542_v29, %v522_v32 }
 0x201   :  { %1703 = vtanh.f32 %v1520_v36 }
 0x202   :  { %1705 = vtanh.f32 %v456_v37  ;;  %v545_v37 = vmul.f32 %v542_v29, %v532_v31 }
 0x208   :  { %v1692_v54 = vpop.eup %1691 }
 0x209   :  { %v514_v55 = vmul.f32 %v1692_v54, %v355_v52  ;;  %v1694_v57 = vpop.eup %1693 }
 0x20a   :  { %v1696_v5 = vpop.eup %1695  ;;  %v512_v9 = vmul.f32 %v1694_v57, %v353_v7  ;;  %v1282_v57 = vld [vmem:[%s2229_s1 + $0x58] sm:$0xff] }
 0x20b   :  { %1530 = vmatprep.subr.mxu0 %v514_v55  ;;  %v513_v6 = vmul.f32 %v1696_v5, %v354_v58  ;;  %v1698_v8 = vpop.eup %1697  ;;  %v1283_v58 = vld [vmem:[%s2229_s1 + $0x60] sm:$0xff]  ;;  %v1284_v5 = vld [vmem:[%s2229_s1 + $0x68] sm:$0xff]  ;;  %v1286_v7 = vld [vmem:[%s2229_s1 + $0x78] sm:$0xff] }
 0x20c   :  { %1531 = vmatpush3.msra.mxu0 %v514_v55  ;;  %v1700_v11 = vpop.eup %1699  ;;  %v511_v12 = vmul.f32 %v1698_v8, %v352_v10  ;;  %v1281_v55 = vld [vmem:[%s2229_s1 + $0x50] sm:$0xff]  ;;  %v1287_v8 = vld [vmem:[%s2229_s1 + $0x80] sm:$0xff] }
 0x20d   :  { %1532 = vmatprep.subr.mxu0 %v513_v6  ;;  %v1702_v14 = vpop.eup %1701  ;;  %v510_v15 = vmul.f32 %v1700_v11, %v351_v13  ;;  %v1308_v10 = vld [vmem:[%s2232_s2 + $0x40] sm:$0xff] }
 0x20e   :  { %1533 = vmatpush3.msra.mxu0 %v513_v6  ;;  %v1704_v19 = vpop.eup %1703  ;;  %v509_v21 = vmul.f32 %v1702_v14, %v350_v16  ;;  %v1285_v6 = vld [vmem:[%s2229_s1 + $0x70] sm:$0xff] }
 0x20f   :  { %1534 = vmatprep.subr.mxu0 %v512_v9  ;;  %v1706_v23 = vpop.eup %1705  ;;  %v508_v25 = vmul.f32 %v1704_v19, %v349_v17 }
 0x210   :  { %1535 = vmatpush3.msra.mxu0 %v512_v9  ;;  %v507_v24 = vmul.f32 %v1706_v23, %v348_v26  ;;  %v1288_v9 = vld [vmem:[%s2229_s1 + $0x88] sm:$0xf] }
 0x211   :  { %1536 = vmatprep.subr.mxu0 %v511_v12 }
 0x212   :  { %1537 = vmatpush3.msra.mxu0 %v511_v12 }
 0x213   :  { %1538 = vmatprep.subr.mxu0 %v510_v15 }
 0x214   :  { %1539 = vmatpush3.msra.mxu0 %v510_v15 }
 0x215   :  { %1540 = vmatprep.subr.mxu0 %v509_v21 }
 0x216   :  { %1541 = vmatpush3.msra.mxu0 %v509_v21 }
 0x217   :  { %1542 = vmatprep.subr.mxu0 %v508_v25 }
 0x218   :  { %1543 = vmatpush3.msra.mxu0 %v508_v25 }
 0x219   :  { %1544 = vmatprep.subr.mxu0 %v507_v24 }
 0x21a   :  { %1545 = vmatpush3.msra.mxu0 %v507_v24 }
 0x21b   :  { %1547 = vmatmul.mubr.msk.f32.vlgmr.msra.gmra.mxu0 %vm365_vm4, %v504_v22  ;;  %1552 = vmatprep.subr.mxu0 %v1745_v0 }
 0x21c   :  { %1549 = vmatprep.mubr.msk.f32.mxu0 %vm365_vm4, %v505_v20 }
 0x21f   :  { %1550 = vmatmul.mubr.msk.f32.gmra.mxu0 %vm365_vm4, %v506_v18 }
 0x220   :  { %1560 = vmatprep.mubr.msk.f32.mxu0 %vm1746_vm0, %v1745_v0 }
 0x2db   :  { %v1548_v30 = vpop.f32.mrf.mxu0 }
 0x2dc   :  { %v631_v39 = vadd.f32 %v1548_v30, %v544_v35 }
 0x2dd   :  { %v625_v33 = vpop.f32.mrf.mxu0 }
 0x2de   :  { %v626_v42 = vadd.f32 %v625_v33, %v543_v38  ;;  %v645_v47 = vmul.f32 %v631_v39, %v1802_v3 }
 0x2df   :  { %v1551_v36 = vpop.f32.mrf.mxu0 }
 0x2e0   :  { %v641_v40 = vadd.f32 %v1551_v36, %v546_v34  ;;  %v644_v51 = vmul.f32 %v626_v42, %v1811_v4  ;;  %v2053_v54 = vadd.f32 %v645_v47, %v1802_v3 }
 0x2e1   :  { %v635_v41 = vpop.f32.mrf.mxu0 }
 0x2e2   :  { %v647_v43 = vmul.f32 %v641_v40, %v1787_v1  ;;  %v636_v45 = vadd.f32 %v635_v41, %v545_v37 }
 0x2e4   :  { %v2043_v44 = vadd.f32 %v647_v43, %v1787_v1  ;;  %v646_v48 = vmul.f32 %v636_v45, %v1792_v2  ;;  %v2058_v1 = vadd.f32 %v644_v51, %v1811_v4  ;;  %v1310_v51 = vld [vmem:[%s2232_s2 + $0x50] sm:$0xff] }
 0x2e6   :  { %v2048_v52 = vadd.f32 %v646_v48, %v1792_v2  ;;  %1553 = vmatpush3.msra.mxu0 %v2043_v44  ;;  %v1280_v2 = vld [vmem:[%s2229_s1 + $0x48] sm:$0xff] }
 0x2e7   :  { %1554 = vmatprep.subr.mxu0 %v1745_v0  ;;  %v1309_v48 = vld [vmem:[%s2232_s2 + $0x48] sm:$0xff] }
 0x2e8   :  { %1555 = vmatpush3.msra.mxu0 %v2048_v52 }
 0x2e9   :  { %1556 = vmatprep.subr.mxu0 %v1745_v0 }
 0x2ea   :  { %1557 = vmatpush3.msra.mxu0 %v2053_v54 }
 0x2eb   :  { %1558 = vmatprep.subr.mxu0 %v1745_v0 }
 0x2ec   :  { %1559 = vmatpush3.msra.mxu0 %v2058_v1 }
 0x2ed   :  { %1561 = vmatmul.mubr.msk.f32.vlgmr.msra.gmra.mxu0 %vm36_vm1, %v1280_v2  ;;  %v1311_v2 = vld [vmem:[%s2232_s2 + $0x58] sm:$0xff] }
 0x2ee   :  { %1563 = vmatprep.mubr.msk.f32.mxu0 %vm1746_vm0, %v1745_v0 }
 0x2f1   :  { %1564 = vmatmul.mubr.msk.f32.gmra.mxu0 %vm36_vm1, %v1281_v55  ;;  %v1312_v55 = vld [vmem:[%s2232_s2 + $0x60] sm:$0xff] }
 0x2f2   :  { %1566 = vmatprep.mubr.msk.f32.mxu0 %vm1746_vm0, %v1745_v0 }
 0x2f5   :  { %1567 = vmatmul.mubr.msk.f32.gmra.mxu0 %vm36_vm1, %v1282_v57 }
 0x2f6   :  { %1569 = vmatprep.mubr.msk.f32.mxu0 %vm1746_vm0, %v1745_v0 }
 0x2f9   :  { %1570 = vmatmul.mubr.msk.f32.gmra.mxu0 %vm36_vm1, %v1283_v58  ;;  %v1313_v58 = vld [vmem:[%s2232_s2 + $0x68] sm:$0xff] }
 0x2fa   :  { %1572 = vmatprep.mubr.msk.f32.mxu0 %vm1746_vm0, %v1745_v0 }
 0x2fd   :  { %1573 = vmatmul.mubr.msk.f32.gmra.mxu0 %vm36_vm1, %v1284_v5  ;;  %v1314_v5 = vld [vmem:[%s2232_s2 + $0x70] sm:$0xff] }
 0x2fe   :  { %1575 = vmatprep.mubr.msk.f32.mxu0 %vm1746_vm0, %v1745_v0 }
 0x301   :  { %1576 = vmatmul.mubr.msk.f32.gmra.mxu0 %vm36_vm1, %v1285_v6  ;;  %v1315_v6 = vld [vmem:[%s2232_s2 + $0x78] sm:$0xff] }
 0x302   :  { %1578 = vmatprep.mubr.msk.f32.mxu0 %vm1746_vm0, %v1745_v0 }
 0x305   :  { %1579 = vmatmul.mubr.msk.f32.gmra.mxu0 %vm36_vm1, %v1286_v7 }
 0x306   :  { %1581 = vmatprep.mubr.msk.f32.mxu0 %vm1746_vm0, %v1745_v0 }
 0x309   :  { %1582 = vmatmul.mubr.msk.f32.gmra.mxu0 %vm36_vm1, %v1287_v8 }
 0x30a   :  { %1584 = vmatprep.mubr.msk.f32.mxu0 %vm1746_vm0, %v1745_v0 }
 0x30d   :  { %1585 = vmatmul.mubr.msk.f32.gmra.mxu0 %vm36_vm1, %v1288_v9 }
 0x30e   :  { %1632 = vmatprep.mubr.msk.f32.mxu0 %vm365_vm4, %v1308_v10 }
 0x3ad   :  { %v755_v11 = vpop.f32.mrf.mxu0 }
 0x3af   :  { %v1562_v12 = vpop.f32.mrf.mxu0 }
 0x3b1   :  { %v760_v13 = vpop.f32.mrf.mxu0 }
 0x3b3   :  { %v1565_v14 = vpop.f32.mrf.mxu0 }
 0x3b5   :  { %v765_v15 = vpop.f32.mrf.mxu0 }
 0x3b7   :  { %v1568_v16 = vpop.f32.mrf.mxu0 }
 0x3b9   :  { %v770_v17 = vpop.f32.mrf.mxu0 }
 0x3bb   :  { %v1571_v19 = vpop.f32.mrf.mxu0 }
 0x3bd   :  { %v775_v21 = vpop.f32.mrf.mxu0 }
 0x3bf   :  { %v1574_v23 = vpop.f32.mrf.mxu0 }
 0x3c1   :  { %v780_v25 = vpop.f32.mrf.mxu0 }
 0x3c3   :  { %v1577_v26 = vpop.f32.mrf.mxu0 }
 0x3c5   :  { %v785_v24 = vpop.f32.mrf.mxu0 }
 0x3c7   :  { %v1580_v22 = vpop.f32.mrf.mxu0 }
 0x3c9   :  { %v790_v20 = vpop.f32.mrf.mxu0 }
 0x3ca   :  { %1707 = vtanh.f32 %v790_v20 }
 0x3cb   :  { %v1583_v18 = vpop.f32.mrf.mxu0  ;;  %1709 = vtanh.f32 %v785_v24 }
 0x3cc   :  { %1711 = vtanh.f32 %v780_v25 }
 0x3cd   :  { %v795_v27 = vpop.f32.mrf.mxu0  ;;  %1713 = vtanh.f32 %v775_v21 }
 0x3ce   :  { %v807_v28 = vsel %vm182_vm2, %v795_v27, -inf  ;;  %1715 = vtanh.f32 %v770_v17 }
 0x3cf   :  { %v808_v29 = vrot.slane %v807_v28, 4  ;;  %v1586_v30 = vpop.f32.mrf.mxu0  ;;  %1717 = vtanh.f32 %v765_v15 }
 0x3d0   :  { %1719 = vtanh.f32 %v760_v13 }
 0x3d1   :  { %v809_v31 = vmax.f32 %v807_v28, %v808_v29  ;;  %1721 = vtanh.f32 %v755_v11 }
 0x3d3   :  { %v810_v32 = vrot.slane %v809_v31, 2 }
 0x3d5   :  { %v811_v33 = vmax.f32 %v809_v31, %v810_v32 }
 0x3d7   :  { %v1708_v34 = vpop.eup %1707  ;;  %v812_v35 = vrot.slane %v811_v33, 1 }
 0x3d8   :  { %1616 = vmatprep.subr.mxu0 %v1708_v34  ;;  %v1710_v36 = vpop.eup %1709 }
 0x3d9   :  { %v813_v37 = vmax.f32 %v811_v33, %v812_v35  ;;  %1617 = vmatpush3.msra.mxu0 %v1708_v34  ;;  %v1712_v38 = vpop.eup %1711 }
 0x3da   :  { %1618 = vmatprep.subr.mxu0 %v1710_v36  ;;  %v1714_v40 = vpop.eup %1713 }
 0x3db   :  { %v814_v39 = vsub.f32 %v795_v27, %v813_v37  ;;  %1619 = vmatpush3.msra.mxu0 %v1710_v36  ;;  %v1716_v42 = vpop.eup %1715 }
 0x3dc   :  { %1620 = vmatprep.subr.mxu0 %v1712_v38  ;;  %v1718_v43 = vpop.eup %1717 }
 0x3dd   :  { %v815_v41 = vmul.f32 1.442695, %v814_v39  ;;  %1621 = vmatpush3.msra.mxu0 %v1712_v38  ;;  %v1720_v45 = vpop.eup %1719 }
 0x3de   :  { %1622 = vmatprep.subr.mxu0 %v1714_v40  ;;  %v1722_v47 = vpop.eup %1721 }
 0x3df   :  { %1723 = vpow2.f32 %v815_v41  ;;  %1623 = vmatpush3.msra.mxu0 %v1714_v40 }
 0x3e0   :  { %1624 = vmatprep.subr.mxu0 %v1716_v42 }
 0x3e1   :  { %1625 = vmatpush3.msra.mxu0 %v1716_v42 }
 0x3e2   :  { %1626 = vmatprep.subr.mxu0 %v1718_v43 }
 0x3e3   :  { %1627 = vmatpush3.msra.mxu0 %v1718_v43 }
 0x3e4   :  { %1628 = vmatprep.subr.mxu0 %v1720_v45 }
 0x3e5   :  { %1629 = vmatpush3.msra.mxu0 %v1720_v45 }
 0x3e6   :  { %1630 = vmatprep.subr.mxu0 %v1722_v47 }
 0x3e7   :  { %1631 = vmatpush3.msra.mxu0 %v1722_v47 }
 0x3e8   :  { %1633 = vmatmul.mubr.msk.f32.vlgmr.msra.gmra.mxu0 %vm365_vm4, %v1309_v48 }
 0x3e9   :  { %1635 = vmatprep.mubr.msk.f32.mxu0 %vm365_vm4, %v1310_v51 }
 0x3ec   :  { %v1724_v57 = vpop.eup %1723  ;;  %1636 = vmatmul.mubr.msk.f32.gmra.mxu0 %vm365_vm4, %v1311_v2 }
 0x3ed   :  { %1588 = vmatpush3.msk.msra.mxu1 %vm182_vm2, %v1724_v57  ;;  %1638 = vmatprep.mubr.msk.f32.mxu0 %vm365_vm4, %v1312_v55 }
 0x3ee   :  { %1590 = vmatmul.mubr.msk.f32.vlgmr.msra.gmra.mxu1 %vm202_vm3, %v1884_v46  ;;  %v1324_v46 = vld [vmem:[%s2233_s3 + $0x20] sm:$0xff] }
 0x3ef   :  { %1592 = vmatprep.mubr.msk.f32.mxu1 %vm1746_vm0, %v1745_v0 }
 0x3f0   :  { %1639 = vmatmul.mubr.msk.f32.gmra.mxu0 %vm365_vm4, %v1313_v58  ;;  %v1325_v58 = vld [vmem:[%s2233_s3 + $0x28] sm:$0xff] }
 0x3f1   :  { %1641 = vmatprep.mubr.msk.f32.mxu0 %vm365_vm4, %v1314_v5  ;;  %v1326_v5 = vld [vmem:[%s2233_s3 + $0x30] sm:$0xff] }
 0x3f2   :  { %1593 = vmatmul.mubr.msk.f32.gmra.mxu1 %vm202_vm3, %v1894_v50 }
 0x3f3   :  { %1595 = vmatprep.mubr.msk.f32.mxu1 %vm1746_vm0, %v1745_v0 }
 0x3f4   :  { %1642 = vmatmul.mubr.msk.f32.gmra.mxu0 %vm365_vm4, %v1315_v6  ;;  %v1327_v6 = vld [vmem:[%s2233_s3 + $0x38] sm:$0xff] }
 0x3f6   :  { %1596 = vmatmul.mubr.msk.f32.gmra.mxu1 %vm202_vm3, %v1903_v53 }
 0x3f7   :  { %1598 = vmatprep.mubr.msk.f32.mxu1 %vm1746_vm0, %v1745_v0 }
 0x3fa   :  { %1599 = vmatmul.mubr.msk.f32.gmra.mxu1 %vm202_vm3, %v1912_v56 }
 0x3fb   :  { %1601 = vmatprep.mubr.msk.f32.mxu1 %vm1746_vm0, %v1745_v0 }
 0x3fe   :  { %1602 = vmatmul.mubr.msk.f32.gmra.mxu1 %vm202_vm3, %v1921_v59 }
 0x3ff   :  { %1604 = vmatprep.mubr.msk.f32.mxu1 %vm1746_vm0, %v1745_v0 }
 0x402   :  { %1605 = vmatmul.mubr.msk.f32.gmra.mxu1 %vm202_vm3, %v1931_v60 }
 0x403   :  { %1607 = vmatprep.mubr.msk.f32.mxu1 %vm1746_vm0, %v1745_v0 }
 0x406   :  { %1608 = vmatmul.mubr.msk.f32.gmra.mxu1 %vm202_vm3, %v1940_v61 }
 0x407   :  { %1610 = vmatprep.mubr.msk.f32.mxu1 %vm1746_vm0, %v1745_v0 }
 0x40a   :  { %1611 = vmatmul.mubr.msk.f32.gmra.mxu1 %vm202_vm3, %v1949_v62 }
 0x40b   :  { %1613 = vmatprep.mubr.msk.f32.mxu1 %vm1746_vm0, %v1745_v0 }
 0x40e   :  { %1614 = vmatmul.mubr.msk.f32.gmra.mxu1 %vm202_vm3, %v1958_v63 }
 0x40f   :  { %1660 = vmatprep.mubr.msk.f32.mxu1 %vm365_vm4, %v1324_v46 }
 0x4a8   :  { %v1634_v60 = vpop.f32.mrf.mxu0 }
 0x4aa   :  { %v1043_v7 = vpop.f32.mrf.mxu0 }
 0x4ac   :  { %v1637_v9 = vpop.f32.mrf.mxu0 }
 0x4ae   :  { %v2187_v50 = vpop.f32.mrf.mxu1  ;;  %v1053_v11 = vpop.f32.mrf.mxu0 }
 0x4b0   :  { %v1591_v53 = vpop.f32.mrf.mxu1  ;;  %v1640_v14 = vpop.f32.mrf.mxu0 }
 0x4b1   :  { %v1111_v53 = vpop.permute.xlu0 %1110 }
 0x4b2   :  { %v891_v56 = vpop.f32.mrf.mxu1  ;;  %v1063_v17 = vpop.f32.mrf.mxu0 }
 0x4b4   :  { %v1594_v59 = vpop.f32.mrf.mxu1  ;;  %v1643_v23 = vpop.f32.mrf.mxu0 }
 0x4b6   :  { %v896_v61 = vpop.f32.mrf.mxu1  ;;  %v1073_v24 = vpop.f32.mrf.mxu0 }
 0x4b8   :  { %v1597_v62 = vpop.f32.mrf.mxu1 }
 0x4ba   :  { %v901_v8 = vpop.f32.mrf.mxu1 }
 0x4bc   :  { %v1600_v0 = vpop.f32.mrf.mxu1 }
 0x4be   :  { %v906_v10 = vpop.f32.mrf.mxu1 }
 0x4c0   :  { %v1603_v63 = vpop.f32.mrf.mxu1 }
 0x4c2   :  { %v911_v12 = vpop.f32.mrf.mxu1 }
 0x4c4   :  { %v1606_v13 = vpop.f32.mrf.mxu1 }
 0x4c6   :  { %v916_v15 = vpop.f32.mrf.mxu1 }
 0x4c8   :  { %v1609_v16 = vpop.f32.mrf.mxu1 }
 0x4ca   :  { %v921_v19 = vpop.f32.mrf.mxu1 }
 0x4cc   :  { %v1612_v21 = vpop.f32.mrf.mxu1 }
 0x4ce   :  { %v926_v25 = vpop.f32.mrf.mxu1 }
 0x4cf   :  { %1725 = vrcp.f32 %v926_v25 }
 0x4d0   :  { %v1615_v26 = vpop.f32.mrf.mxu1  ;;  %1727 = vtanh.f32 %v1643_v23 }
 0x4d1   :  { %1729 = vtanh.f32 %v1073_v24 }
 0x4d2   :  { %1731 = vtanh.f32 %v1640_v14 }
 0x4d3   :  { %1733 = vtanh.f32 %v1063_v17 }
 0x4d4   :  { %1735 = vtanh.f32 %v1637_v9 }
 0x4d5   :  { %1737 = vtanh.f32 %v1053_v11 }
 0x4d6   :  { %1739 = vtanh.f32 %v1634_v60 }
 0x4d7   :  { %1741 = vtanh.f32 %v1043_v7 }
 0x4dc   :  { %v1726_v22 = vpop.eup %1725 }
 0x4dd   :  { %v934_v20 = vrot.slane %v1726_v22, %v2018_v49  ;;  %v943_v18 = vmul.f32 %v1726_v22, %v926_v25  ;;  %v1728_v27 = vpop.eup %1727 }
 0x4de   :  { %v1730_v30 = vpop.eup %1729 }
 0x4df   :  { %v942_v28 = vmul.f32 %v934_v20, %v921_v19  ;;  %v941_v29 = vmul.f32 %v934_v20, %v916_v15  ;;  %v940_v32 = vmul.f32 %v934_v20, %v911_v12  ;;  %v939_v34 = vmul.f32 %v934_v20, %v906_v10  ;;  %v1732_v35 = vpop.eup %1731  ;;  %v1121_v10 = vpop.permute.xlu0 %1120 }
 0x4e0   :  { %v938_v37 = vmul.f32 %v934_v20, %v901_v8  ;;  %v1734_v38 = vpop.eup %1733  ;;  %v937_v40 = vmul.f32 %v934_v20, %v896_v61  ;;  %v936_v43 = vmul.f32 %v934_v20, %v891_v56  ;;  %v935_v48 = vmul.f32 %v934_v20, %v2187_v50  ;;  %v1116_v50 = vpop.permute.xlu1 %1115 }
 0x4e1   :  { %v1102_v31 = vmul.f32 %v1728_v27, %v942_v28  ;;  %v1101_v33 = vmul.f32 %v1730_v30, %v941_v29  ;;  %v1100_v36 = vmul.f32 %v1732_v35, %v940_v32  ;;  %v1099_v39 = vmul.f32 %v1734_v38, %v939_v34  ;;  %v1736_v41 = vpop.eup %1735 }
 0x4e2   :  { %v1098_v42 = vmul.f32 %v1736_v41, %v938_v37  ;;  %v1738_v45 = vpop.eup %1737  ;;  %v1131_v46 = vrot.slane %v943_v18, %v2018_v49 }
 0x4e3   :  { %1644 = vmatprep.subr.mxu1 %v1102_v31  ;;  %v1097_v47 = vmul.f32 %v1738_v45, %v937_v40  ;;  %v1740_v51 = vpop.eup %1739 }
 0x4e4   :  { %1645 = vmatpush3.msra.mxu1 %v1102_v31  ;;  %v1096_v2 = vmul.f32 %v1740_v51, %v936_v43  ;;  %v1742_v55 = vpop.eup %1741  ;;  %v1133_v56 = vmul.f32 %v1131_v46, %v1116_v50  ;;  %v1132_v61 = vmul.f32 %v1131_v46, %v1111_v53  ;;  %v1126_v62 = vpop.permute.xlu1 %1125  ;;  %v1134_v49 = vmul.f32 %v1131_v46, %v1121_v10 }
 0x4e5   :  { %1646 = vmatprep.subr.mxu1 %v1101_v33  ;;  %v1095_v57 = vmul.f32 %v1742_v55, %v935_v48  ;;  %v1135_v9 = vmul.f32 %v1131_v46, %v1126_v62 }
 0x4e6   :  { %1647 = vmatpush3.msra.mxu1 %v1101_v33 }
 0x4e7   :  { %1648 = vmatprep.subr.mxu1 %v1100_v36 }
 0x4e8   :  { %1649 = vmatpush3.msra.mxu1 %v1100_v36 }
 0x4e9   :  { %1650 = vmatprep.subr.mxu1 %v1099_v39 }
 0x4ea   :  { %1651 = vmatpush3.msra.mxu1 %v1099_v39 }
 0x4eb   :  { %1652 = vmatprep.subr.mxu1 %v1098_v42 }
 0x4ec   :  { %1653 = vmatpush3.msra.mxu1 %v1098_v42 }
 0x4ed   :  { %1654 = vmatprep.subr.mxu1 %v1097_v47 }
 0x4ee   :  { %1655 = vmatpush3.msra.mxu1 %v1097_v47 }
 0x4ef   :  { %1656 = vmatprep.subr.mxu1 %v1096_v2 }
 0x4f0   :  { %1657 = vmatpush3.msra.mxu1 %v1096_v2 }
 0x4f1   :  { %1658 = vmatprep.subr.mxu1 %v1095_v57 }
 0x4f2   :  { %1659 = vmatpush3.msra.mxu1 %v1095_v57 }
 0x4f3   :  { %1661 = vmatmul.mubr.msk.f32.vlgmr.msra.gmra.mxu1 %vm365_vm4, %v1325_v58 }
 0x4f4   :  { %1663 = vmatprep.mubr.msk.f32.mxu1 %vm365_vm4, %v1326_v5 }
 0x4f7   :  { %1664 = vmatmul.mubr.msk.f32.gmra.mxu1 %vm365_vm4, %v1327_v6 }
 0x5b3   :  { %v1662_v59 = vpop.f32.mrf.mxu1 }
 0x5b4   :  { %v1220_v60 = vadd.f32 %v1662_v59, %v1133_v56 }
 0x5b5   :  { %v1214_v7 = vpop.f32.mrf.mxu1 }
 0x5b6   :  { %v1234_v8 = vmul.f32 %v1220_v60, %v1802_v3  ;;  %v1215_v0 = vadd.f32 %v1214_v7, %v1132_v61  ;;  %v1743_v3 = vld [vmem:[%s2228_s0 + $0x18] sm:$0xff] }
 0x5b7   :  { %v1665_v63 = vpop.f32.mrf.mxu1 }
 0x5b8   :  { %v1238_v11 = vadd.f32 %v1234_v8, %v2053_v54  ;;  %v1233_v12 = vmul.f32 %v1215_v0, %v1811_v4  ;;  %v1230_v13 = vadd.f32 %v1665_v63, %v1135_v9  ;;  %v1744_v54 = vld [vmem:[%s2228_s0 + $0x10] sm:$0xff] }
 0x5b9   :  { %v1224_v14 = vpop.f32.mrf.mxu1 }
 0x5ba   :  { %1242 = vst [vmem:[%s2234_s6 + $0x8] sm:$0xff] %v1238_v11  ;;  %v1237_v15 = vadd.f32 %v1233_v12, %v2058_v1  ;;  %v1236_v16 = vmul.f32 %v1743_v3, %v1230_v13  ;;  %v1225_v17 = vadd.f32 %v1224_v14, %v1134_v49 }
 0x5bc   :  { %1241 = vst [vmem:[%s2234_s6] sm:$0xff] %v1237_v15  ;;  %v1240_v4 = vadd.f32 %v1236_v16, %v2043_v44  ;;  %v1235_v19 = vmul.f32 %v1744_v54, %v1225_v17 }
 0x5be   :  { %1244 = vst [vmem:[%s2234_s6 + $0x18] sm:$0xff] %v1240_v4  ;;  %v1239_v1 = vadd.f32 %v1235_v19, %v2048_v52 }
 0x5c0   :  { %1243 = vst [vmem:[%s2234_s6 + $0x10] sm:$0xff] %v1239_v1 }

</bundles_post_ra>
